<compile_context>
chip_gen: v5e
topology: v5e:2x2
jax: 0.10.0
libtpu: 0.0.40
codegen_flags: <defaults>
</compile_context>

<pallas_src>
import functools
import numpy as np
import jax
import jax.numpy as jnp
from jax.experimental import pallas as pl
from jax.experimental.pallas import tpu as pltpu


# ------------------------------ fused kernel --------------------------------

def _an_fused_kernel(
        # scalar-prefetch (SMEM)
        nbr_idx_ref, nbr_mask_ref,
        # per-batch inputs (leading batch axis squeezed by BlockSpec)
        obs_ref, obs_all_ref, edge_ref,
        # adjacency
        adj_ref, adj_scatter_ref,
        # weights: pre-transposed to (in, out); biases as (1, out)
        src_wt, src_b, obs_wt, obs_b,
        res_wt, res_b, w1t, w2t, w3we_t, emb_bc,
        g1a_t, g1b_t, g1_b, g2a_t, g2b_t, g2_b,
        base_w1t, base_b1, base_w2t, base_b2,
        act_wt, act_b,
        # output
        out_ref,
        # scratch
        adapt_scr, sel_scr,
        *, d, ma):
    f32 = jnp.float32
    b = pl.program_id(0)

    # source_obs_map: (1, S) @ (S, D*MA)
    obs_emb = jnp.dot(obs_ref[...], src_wt[...], preferred_element_type=f32) + src_b[...]

    # obs_map (mean_field=1 -> no last-feature slicing): (N, F) @ (F, D)
    x = jnp.dot(obs_all_ref[...], obs_wt[...], preferred_element_type=f32) + obs_b[...]

    # adaptive adjacency (already A + PA; dropout = identity in eval mode)
    adj = adj_ref[...]                                     # (N, N)
    rowsum = jnp.sum(adj, axis=1, keepdims=True)           # (N, 1)

    # EdgeConvGat, vectorized (see header comment for the algebra)
    ew = jnp.dot(adj_scatter_ref[...], edge_ref[...],
                 preferred_element_type=f32)               # (N, E) = sum_j adj[i,j]*edge[i,j,:]
    agg = (rowsum * (jnp.dot(x, w1t[...], preferred_element_type=f32) + emb_bc[...])
           + jnp.dot(adj, jnp.dot(x, w2t[...], preferred_element_type=f32),
                     preferred_element_type=f32)
           + jnp.dot(ew, w3we_t[...], preferred_element_type=f32))

    # residual + relu -> VMEM scratch so neighbor rows can be dynamically gathered
    res = jnp.dot(x, res_wt[...], preferred_element_type=f32) + res_b[...]
    adapt_scr[...] = jnp.maximum(res + agg, 0.0)           # (N, D)

    # gather the ego road's neighbors, mask empty slots with -1, pack (1, MA*D)
    for k in range(ma):                                    # static unroll (MA is tiny)
        idx = nbr_idx_ref[b, k]
        keep = nbr_mask_ref[b, k].astype(f32)              # 0.0 or 1.0
        row = adapt_scr[pl.ds(idx, 1), :]                  # (1, D)
        # keep==1 -> row ; keep==0 -> -1   (matches masked_fill with -1)
        sel_scr[:, pl.ds(k * d, d)] = row * keep + (keep - 1.0)
    sel = sel_scr[...]                                     # (1, MA*D)

    # gated_layer + chunk + sigmoid gate; the concat(obs_emb, sel) is avoided by
    # splitting the gated weight columns into the (obs_emb | selected) halves.
    g1 = (jnp.dot(obs_emb, g1a_t[...], preferred_element_type=f32)
          + jnp.dot(sel, g1b_t[...], preferred_element_type=f32) + g1_b[...])
    g2 = (jnp.dot(obs_emb, g2a_t[...], preferred_element_type=f32)
          + jnp.dot(sel, g2b_t[...], preferred_element_type=f32) + g2_b[...])
    gated = g1 * jax.nn.sigmoid(g2)                        # (1, D)

    # TODO(synk): MLPBase definition is not provided in the reference source;
    # approximated as Linear(D->H) + ReLU + Linear(H->H), then the reference's F.relu.
    h = jnp.maximum(jnp.dot(gated, base_w1t[...], preferred_element_type=f32)
                    + base_b1[...], 0.0)
    h = jnp.dot(h, base_w2t[...], preferred_element_type=f32) + base_b2[...]
    h = jnp.maximum(h, 0.0)                                # F.relu(self.base(obs_gated))

    # action_output
    out_ref[...] = jnp.dot(h, act_wt[...], preferred_element_type=f32) + act_b[...]


# ------------------------------ model forward -------------------------------

def an_model_forward(kp, obs, obs_all, edge_attrs, ridxs):
    B, S = obs.shape
    N, F_OBS = obs_all.shape[1], obs_all.shape[2]
    E = edge_attrs.shape[-1]
    D = kp["obs_wt"].shape[1]
    MA = kp["road_neighbor_idxs"].shape[1]

    # adaptive adjacency (eval -> dropout identity) + its block-diagonal scatter,
    # which turns  sum_j adj[i,j]*edge[i,j,:]  into a single MXU matmul in-kernel.
    adj = kp["A"] + kp["PA"]                                            # (N, N)
    adj_scatter = (jnp.eye(N, dtype=jnp.float32)[:, :, None]
                   * adj[None, :, :]).reshape(N, N * N)                 # (N, N*N)

    nbr_idx = kp["road_neighbor_idxs"][ridxs].astype(jnp.int32)         # (B, MA)
    nbr_mask = kp["road_neighbor_masks"][ridxs].astype(jnp.int32)       # (B, MA)

    obs3 = obs[:, None, :]                                              # (B, 1, S)
    edge_flat = edge_attrs.reshape(B, N * N, E)                         # (B, N*N, E)

    consts = (adj, adj_scatter,
              kp["src_wt"], kp["src_b"], kp["obs_wt"], kp["obs_b"],
              kp["res_wt"], kp["res_b"], kp["w1t"], kp["w2t"],
              kp["w3we_t"], kp["emb_bc"],
              kp["g1a_t"], kp["g1b_t"], kp["g1_b"],
              kp["g2a_t"], kp["g2b_t"], kp["g2_b"],
              kp["base_w1t"], kp["base_b1"], kp["base_w2t"], kp["base_b2"],
              kp["act_wt"], kp["act_b"])

    def bspec(*trailing):        # per-batch block, leading batch axis squeezed
        zeros = (0,) * len(trailing)
        return pl.BlockSpec((None,) + trailing, lambda b, i, m: (b,) + zeros)

    def cspec(arr):              # whole-array block, same for every grid step
        zeros = (0,) * arr.ndim
        return pl.BlockSpec(arr.shape, lambda b, i, m: zeros)

    grid_spec = pltpu.PrefetchScalarGridSpec(
        num_scalar_prefetch=2,                 # nbr_idx, nbr_mask -> SMEM
        grid=(B,),
        in_specs=[bspec(1, S), bspec(N, F_OBS), bspec(N * N, E)]
                 + [cspec(a) for a in consts],
        out_specs=bspec(1, MA),
        scratch_shapes=[pltpu.VMEM((N, D), jnp.float32),      # obs_all_adaptive
                        pltpu.VMEM((1, MA * D), jnp.float32)],  # packed selection
    )

    out = pl.pallas_call(
        functools.partial(_an_fused_kernel, d=D, ma=MA),
        out_shape=jax.ShapeDtypeStruct((B, 1, MA), jnp.float32),
        grid_spec=grid_spec,
        compiler_params=pltpu.CompilerParams(
            dimension_semantics=("parallel",)),   # v7x: batch over both TCs
    )(nbr_idx, nbr_mask, obs3, obs_all, edge_flat, *consts)
    return out.reshape(B, MA)


# ------------------------------ param init ----------------------------------

def init_params(key, *, num_roads, max_action, source_obs_dim, obs_dim, edge_dim,
                out_dim=16, hidden=32, conv_times=2):
    keys = iter(jax.random.split(key, 64))

    def lin(o, i, scale=0.1):
        w = jax.random.normal(next(keys), (o, i), dtype=jnp.float32) * scale
        b = jax.random.normal(next(keys), (o,), dtype=jnp.float32) * 0.01
        return w, b

    # graph structure: neighbors[i] = {(i+1), (i+2), (i+5)} mod N  (3 <= max_action)
    neighbors = {i: [(i + 1) % num_roads, (i + 2) % num_roads, (i + 5) % num_roads]
                 for i in range(num_roads)}
    A = np.zeros((num_roads, num_roads), dtype=np.float32)
    for i in range(num_roads):
        for j in range(num_roads):
            if i in neighbors[j]:
                A[i][j] = 1.0
    nbr_idx = np.zeros((num_roads, max_action), dtype=np.int32)
    nbr_mask = np.zeros((num_roads, max_action), dtype=np.int32)
    for i in range(num_roads):
        for k, j in enumerate(neighbors[i]):
            nbr_idx[i][k] = j
            nbr_mask[i][k] = 1

    params = {
        "A": jnp.asarray(A),
        "PA": jnp.full((num_roads, num_roads), 1e-6, dtype=jnp.float32),
        "road_neighbor_idxs": jnp.asarray(nbr_idx),
        "road_neighbor_masks": jnp.asarray(nbr_mask),
        "residual": [],
        "gconv": [],
    }
    params["src_w"], params["src_b"] = lin(out_dim * max_action, source_obs_dim)
    params["obs_w"], params["obs_b"] = lin(out_dim, obs_dim)       # mean_field=1
    for _ in range(conv_times):
        rw, rb = lin(out_dim, out_dim)
        params["residual"].append({"w": rw, "b": rb})
        ew, eb = lin(out_dim, edge_dim)                            # edge_map
        mw, mb = lin(out_dim, 3 * out_dim)                         # emb (EdgeConvGat)
        params["gconv"].append({"edge_w": ew, "edge_b": eb, "emb_w": mw, "emb_b": mb})
    gw, gb = lin(2 * out_dim, 2 * out_dim * max_action)            # gated_layer
    params["gated_w1"], params["gated_b1"] = gw[:out_dim], gb[:out_dim]
    params["gated_w2"], params["gated_b2"] = gw[out_dim:], gb[out_dim:]
    params["base_w1"], params["base_b1"] = lin(hidden, out_dim)
    params["base_w2"], params["base_b2"] = lin(hidden, hidden)
    params["act_w"], params["act_b"] = lin(max_action, hidden)
    return params


def prepare_kernel_params(params, *, out_dim=16, max_action=4):
    """One-time host-side prep: transpose Linear weights to (in, out), split the
    EdgeConvGat emb weight into its cat(x_i, x_j, edge_map) column blocks, fold
    edge_map into W3 (W3@We and be@W3.T), and split the gated weight into its
    (obs_emb | selected) input halves.  Only the LAST gconv/residual layer is
    kept -- earlier loop iterations never reach the output in the reference."""
    D, MA = out_dim, max_action
    g = params["gconv"][-1]
    r = params["residual"][-1]
    w_emb, b_emb = g["emb_w"], g["emb_b"]                  # (D, 3D), (D,)
    w1, w2, w3 = w_emb[:, :D], w_emb[:, D:2 * D], w_emb[:, 2 * D:]
    we, be = g["edge_w"], g["edge_b"]                      # (D, E), (D,)
    row = lambda v: v[None, :]
    return {
        "A": params["A"], "PA": params["PA"],
        "road_neighbor_idxs": params["road_neighbor_idxs"],
        "road_neighbor_masks": params["road_neighbor_masks"],
        "src_wt": params["src_w"].T, "src_b": row(params["src_b"]),
        "obs_wt": params["obs_w"].T, "obs_b": row(params["obs_b"]),
        "res_wt": r["w"].T, "res_b": row(r["b"]),
        "w1t": w1.T, "w2t": w2.T,
        "w3we_t": (w3 @ we).T,                             # (E, D)
        "emb_bc": row(b_emb + be @ w3.T),                  # (1, D)
        "g1a_t": params["gated_w1"][:, :D * MA].T,
        "g1b_t": params["gated_w1"][:, D * MA:].T,
        "g1_b": row(params["gated_b1"]),
        "g2a_t": params["gated_w2"][:, :D * MA].T,
        "g2b_t": params["gated_w2"][:, D * MA:].T,
        "g2_b": row(params["gated_b2"]),
        "base_w1t": params["base_w1"].T, "base_b1": row(params["base_b1"]),
        "base_w2t": params["base_w2"].T, "base_b2": row(params["base_b2"]),
        "act_wt": params["act_w"].T, "act_b": row(params["act_b"]),
    }


# --------------------------------- main --------------------------------------

if __name__ == "__main__":
    B = 2
    num_roads = 8
    max_action = 4
    source_obs_dim = 10
    obs_dim = 12
    edge_dim = 6
    out_dim = 16

    key = jax.random.PRNGKey(0)
    k_params, kx1, kx2, kx3 = jax.random.split(key, 4)

    params = init_params(k_params, num_roads=num_roads, max_action=max_action,
                         source_obs_dim=source_obs_dim, obs_dim=obs_dim,
                         edge_dim=edge_dim, out_dim=out_dim)
    kparams = prepare_kernel_params(params, out_dim=out_dim, max_action=max_action)

    obs = jax.random.normal(kx1, (B, source_obs_dim), dtype=jnp.float32)
    obs_all = jax.random.normal(kx2, (B, num_roads, obs_dim), dtype=jnp.float32)
    edge_attrs = jax.random.normal(kx3, (B, num_roads, num_roads, edge_dim),
                                   dtype=jnp.float32)
    ridxs = jnp.array([0, 3], dtype=jnp.int32)

    out = jax.jit(an_model_forward)(kparams, obs, obs_all, edge_attrs, ridxs)
    out = jax.block_until_ready(out)
    assert out.shape == (B, max_action)
    assert bool(jnp.all(jnp.isfinite(out)))
    print("KERNEL_OK")
</pallas_src>

<mosaic_0001>
module attributes {stable_mosaic.version = 11 : i64} {
  func.func @_an_fused_kernel(%arg0: i32, %arg1: memref<2x4xi32, #tpu.memory_space<smem>>, %arg2: memref<2x4xi32, #tpu.memory_space<smem>>, %arg3: memref<1x1x10xf32, #tpu.memory_space<vmem>>, %arg4: memref<1x8x12xf32, #tpu.memory_space<vmem>>, %arg5: memref<1x64x6xf32, #tpu.memory_space<vmem>>, %arg6: memref<8x8xf32, #tpu.memory_space<vmem>>, %arg7: memref<8x64xf32, #tpu.memory_space<vmem>>, %arg8: memref<10x64xf32, #tpu.memory_space<vmem>>, %arg9: memref<1x64xf32, #tpu.memory_space<vmem>>, %arg10: memref<12x16xf32, #tpu.memory_space<vmem>>, %arg11: memref<1x16xf32, #tpu.memory_space<vmem>>, %arg12: memref<16x16xf32, #tpu.memory_space<vmem>>, %arg13: memref<1x16xf32, #tpu.memory_space<vmem>>, %arg14: memref<16x16xf32, #tpu.memory_space<vmem>>, %arg15: memref<16x16xf32, #tpu.memory_space<vmem>>, %arg16: memref<6x16xf32, #tpu.memory_space<vmem>>, %arg17: memref<1x16xf32, #tpu.memory_space<vmem>>, %arg18: memref<64x16xf32, #tpu.memory_space<vmem>>, %arg19: memref<64x16xf32, #tpu.memory_space<vmem>>, %arg20: memref<1x16xf32, #tpu.memory_space<vmem>>, %arg21: memref<64x16xf32, #tpu.memory_space<vmem>>, %arg22: memref<64x16xf32, #tpu.memory_space<vmem>>, %arg23: memref<1x16xf32, #tpu.memory_space<vmem>>, %arg24: memref<16x32xf32, #tpu.memory_space<vmem>>, %arg25: memref<1x32xf32, #tpu.memory_space<vmem>>, %arg26: memref<32x32xf32, #tpu.memory_space<vmem>>, %arg27: memref<1x32xf32, #tpu.memory_space<vmem>>, %arg28: memref<32x4xf32, #tpu.memory_space<vmem>>, %arg29: memref<1x4xf32, #tpu.memory_space<vmem>>, %arg30: memref<1x1x4xf32, #tpu.memory_space<vmem>>, %arg31: memref<8x16xf32, #tpu.memory_space<vmem>>, %arg32: memref<1x64xf32, #tpu.memory_space<vmem>>) attributes {dimension_semantics = [#tpu.dimension_semantics<parallel>], iteration_bounds = array<i64: 2>, scalar_prefetch = 2 : i64, scratch_operands = 2 : i64, tpu.core_type = #tpu.core_type<tc>, window_params = [{transform_indices = @transform_0, window_bounds = array<i64: 1, 1, 10>}, {transform_indices = @transform_1, window_bounds = array<i64: 1, 8, 12>}, {transform_indices = @transform_2, window_bounds = array<i64: 1, 64, 6>}, {pipeline_mode = #tpu.pipeline_mode<synchronous>, transform_indices = @transform_3, window_bounds = array<i64: 8, 8>}, {pipeline_mode = #tpu.pipeline_mode<synchronous>, transform_indices = @transform_4, window_bounds = array<i64: 8, 64>}, {pipeline_mode = #tpu.pipeline_mode<synchronous>, transform_indices = @transform_5, window_bounds = array<i64: 10, 64>}, {pipeline_mode = #tpu.pipeline_mode<synchronous>, transform_indices = @transform_6, window_bounds = array<i64: 1, 64>}, {pipeline_mode = #tpu.pipeline_mode<synchronous>, transform_indices = @transform_7, window_bounds = array<i64: 12, 16>}, {pipeline_mode = #tpu.pipeline_mode<synchronous>, transform_indices = @transform_8, window_bounds = array<i64: 1, 16>}, {pipeline_mode = #tpu.pipeline_mode<synchronous>, transform_indices = @transform_9, window_bounds = array<i64: 16, 16>}, {pipeline_mode = #tpu.pipeline_mode<synchronous>, transform_indices = @transform_10, window_bounds = array<i64: 1, 16>}, {pipeline_mode = #tpu.pipeline_mode<synchronous>, transform_indices = @transform_11, window_bounds = array<i64: 16, 16>}, {pipeline_mode = #tpu.pipeline_mode<synchronous>, transform_indices = @transform_12, window_bounds = array<i64: 16, 16>}, {pipeline_mode = #tpu.pipeline_mode<synchronous>, transform_indices = @transform_13, window_bounds = array<i64: 6, 16>}, {pipeline_mode = #tpu.pipeline_mode<synchronous>, transform_indices = @transform_14, window_bounds = array<i64: 1, 16>}, {pipeline_mode = #tpu.pipeline_mode<synchronous>, transform_indices = @transform_15, window_bounds = array<i64: 64, 16>}, {pipeline_mode = #tpu.pipeline_mode<synchronous>, transform_indices = @transform_16, window_bounds = array<i64: 64, 16>}, {pipeline_mode = #tpu.pipeline_mode<synchronous>, transform_indices = @transform_17, window_bounds = array<i64: 1, 16>}, {pipeline_mode = #tpu.pipeline_mode<synchronous>, transform_indices = @transform_18, window_bounds = array<i64: 64, 16>}, {pipeline_mode = #tpu.pipeline_mode<synchronous>, transform_indices = @transform_19, window_bounds = array<i64: 64, 16>}, {pipeline_mode = #tpu.pipeline_mode<synchronous>, transform_indices = @transform_20, window_bounds = array<i64: 1, 16>}, {pipeline_mode = #tpu.pipeline_mode<synchronous>, transform_indices = @transform_21, window_bounds = array<i64: 16, 32>}, {pipeline_mode = #tpu.pipeline_mode<synchronous>, transform_indices = @transform_22, window_bounds = array<i64: 1, 32>}, {pipeline_mode = #tpu.pipeline_mode<synchronous>, transform_indices = @transform_23, window_bounds = array<i64: 32, 32>}, {pipeline_mode = #tpu.pipeline_mode<synchronous>, transform_indices = @transform_24, window_bounds = array<i64: 1, 32>}, {pipeline_mode = #tpu.pipeline_mode<synchronous>, transform_indices = @transform_25, window_bounds = array<i64: 32, 4>}, {pipeline_mode = #tpu.pipeline_mode<synchronous>, transform_indices = @transform_26, window_bounds = array<i64: 1, 4>}, {transform_indices = @transform_27, window_bounds = array<i64: 1, 1, 4>}]} {
    %c0 = arith.constant 0 : index
    %c0_0 = arith.constant 0 : index
    %c0_1 = arith.constant 0 : index
    %0 = vector.load %arg3[%c0, %c0_0, %c0_1] : memref<1x1x10xf32, #tpu.memory_space<vmem>>, vector<1x1x10xf32>
    %1 = vector.shape_cast %0 : vector<1x1x10xf32> to vector<1x10xf32>
    %c0_2 = arith.constant 0 : index
    %c0_3 = arith.constant 0 : index
    %2 = vector.load %arg8[%c0_2, %c0_3] : memref<10x64xf32, #tpu.memory_space<vmem>>, vector<10x64xf32>
    %cst = arith.constant dense<0.000000e+00> : vector<1x64xf32>
    %3 = tpu.matmul %1, %2, %cst {dimension_numbers = #tpu.dot_dimension_numbers<[1], [0], [0], [1], [0, 0, 1, 1], [], []>} : vector<1x10xf32>, vector<10x64xf32>, vector<1x64xf32> -> vector<1x64xf32>
    %c0_4 = arith.constant 0 : index
    %c0_5 = arith.constant 0 : index
    %4 = vector.load %arg9[%c0_4, %c0_5] : memref<1x64xf32, #tpu.memory_space<vmem>>, vector<1x64xf32>
    %5 = arith.addf %3, %4 : vector<1x64xf32>
    %c0_6 = arith.constant 0 : index
    %c0_7 = arith.constant 0 : index
    %c0_8 = arith.constant 0 : index
    %6 = vector.load %arg4[%c0_6, %c0_7, %c0_8] : memref<1x8x12xf32, #tpu.memory_space<vmem>>, vector<1x8x12xf32>
    %7 = vector.shape_cast %6 : vector<1x8x12xf32> to vector<8x12xf32>
    %c0_9 = arith.constant 0 : index
    %c0_10 = arith.constant 0 : index
    %8 = vector.load %arg10[%c0_9, %c0_10] : memref<12x16xf32, #tpu.memory_space<vmem>>, vector<12x16xf32>
    %cst_11 = arith.constant dense<0.000000e+00> : vector<8x16xf32>
    %9 = tpu.matmul %7, %8, %cst_11 {dimension_numbers = #tpu.dot_dimension_numbers<[1], [0], [0], [1], [0, 0, 1, 1], [], []>} : vector<8x12xf32>, vector<12x16xf32>, vector<8x16xf32> -> vector<8x16xf32>
    %c0_12 = arith.constant 0 : index
    %c0_13 = arith.constant 0 : index
    %10 = vector.load %arg11[%c0_12, %c0_13] : memref<1x16xf32, #tpu.memory_space<vmem>>, vector<1x16xf32>
    %11 = vector.broadcast %10 : vector<1x16xf32> to vector<8x16xf32>
    %12 = arith.addf %9, %11 : vector<8x16xf32>
    %c0_14 = arith.constant 0 : index
    %c0_15 = arith.constant 0 : index
    %13 = vector.load %arg6[%c0_14, %c0_15] : memref<8x8xf32, #tpu.memory_space<vmem>>, vector<8x8xf32>
    %cst_16 = arith.constant dense<0.000000e+00> : vector<8xf32>
    %14 = vector.multi_reduction <add>, %13, %cst_16 [1] : vector<8x8xf32> to vector<8xf32>
    %15 = vector.shape_cast %14 : vector<8xf32> to vector<8x1xf32>
    %c0_17 = arith.constant 0 : index
    %c0_18 = arith.constant 0 : index
    %16 = vector.load %arg7[%c0_17, %c0_18] : memref<8x64xf32, #tpu.memory_space<vmem>>, vector<8x64xf32>
    %c0_19 = arith.constant 0 : index
    %c0_20 = arith.constant 0 : index
    %c0_21 = arith.constant 0 : index
    %17 = vector.load %arg5[%c0_19, %c0_20, %c0_21] : memref<1x64x6xf32, #tpu.memory_space<vmem>>, vector<1x64x6xf32>
    %18 = vector.shape_cast %17 : vector<1x64x6xf32> to vector<64x6xf32>
    %cst_22 = arith.constant dense<0.000000e+00> : vector<8x6xf32>
    %19 = tpu.matmul %16, %18, %cst_22 {dimension_numbers = #tpu.dot_dimension_numbers<[1], [0], [0], [1], [0, 0, 1, 1], [], []>} : vector<8x64xf32>, vector<64x6xf32>, vector<8x6xf32> -> vector<8x6xf32>
    %c0_23 = arith.constant 0 : index
    %c0_24 = arith.constant 0 : index
    %20 = vector.load %arg14[%c0_23, %c0_24] : memref<16x16xf32, #tpu.memory_space<vmem>>, vector<16x16xf32>
    %cst_25 = arith.constant dense<0.000000e+00> : vector<8x16xf32>
    %21 = tpu.matmul %12, %20, %cst_25 {dimension_numbers = #tpu.dot_dimension_numbers<[1], [0], [0], [1], [0, 0, 1, 1], [], []>} : vector<8x16xf32>, vector<16x16xf32>, vector<8x16xf32> -> vector<8x16xf32>
    %c0_26 = arith.constant 0 : index
    %c0_27 = arith.constant 0 : index
    %22 = vector.load %arg17[%c0_26, %c0_27] : memref<1x16xf32, #tpu.memory_space<vmem>>, vector<1x16xf32>
    %23 = vector.broadcast %22 : vector<1x16xf32> to vector<8x16xf32>
    %24 = arith.addf %21, %23 : vector<8x16xf32>
    %25 = vector.broadcast %15 : vector<8x1xf32> to vector<8x16xf32>
    %26 = arith.mulf %25, %24 : vector<8x16xf32>
    %c0_28 = arith.constant 0 : index
    %c0_29 = arith.constant 0 : index
    %27 = vector.load %arg15[%c0_28, %c0_29] : memref<16x16xf32, #tpu.memory_space<vmem>>, vector<16x16xf32>
    %cst_30 = arith.constant dense<0.000000e+00> : vector<8x16xf32>
    %28 = tpu.matmul %12, %27, %cst_30 {dimension_numbers = #tpu.dot_dimension_numbers<[1], [0], [0], [1], [0, 0, 1, 1], [], []>} : vector<8x16xf32>, vector<16x16xf32>, vector<8x16xf32> -> vector<8x16xf32>
    %cst_31 = arith.constant dense<0.000000e+00> : vector<8x16xf32>
    %29 = tpu.matmul %13, %28, %cst_31 {dimension_numbers = #tpu.dot_dimension_numbers<[1], [0], [0], [1], [0, 0, 1, 1], [], []>} : vector<8x8xf32>, vector<8x16xf32>, vector<8x16xf32> -> vector<8x16xf32>
    %30 = arith.addf %26, %29 : vector<8x16xf32>
    %c0_32 = arith.constant 0 : index
    %c0_33 = arith.constant 0 : index
    %31 = vector.load %arg16[%c0_32, %c0_33] : memref<6x16xf32, #tpu.memory_space<vmem>>, vector<6x16xf32>
    %cst_34 = arith.constant dense<0.000000e+00> : vector<8x16xf32>
    %32 = tpu.matmul %19, %31, %cst_34 {dimension_numbers = #tpu.dot_dimension_numbers<[1], [0], [0], [1], [0, 0, 1, 1], [], []>} : vector<8x6xf32>, vector<6x16xf32>, vector<8x16xf32> -> vector<8x16xf32>
    %33 = arith.addf %30, %32 : vector<8x16xf32>
    %c0_35 = arith.constant 0 : index
    %c0_36 = arith.constant 0 : index
    %34 = vector.load %arg12[%c0_35, %c0_36] : memref<16x16xf32, #tpu.memory_space<vmem>>, vector<16x16xf32>
    %cst_37 = arith.constant dense<0.000000e+00> : vector<8x16xf32>
    %35 = tpu.matmul %12, %34, %cst_37 {dimension_numbers = #tpu.dot_dimension_numbers<[1], [0], [0], [1], [0, 0, 1, 1], [], []>} : vector<8x16xf32>, vector<16x16xf32>, vector<8x16xf32> -> vector<8x16xf32>
    %c0_38 = arith.constant 0 : index
    %c0_39 = arith.constant 0 : index
    %36 = vector.load %arg13[%c0_38, %c0_39] : memref<1x16xf32, #tpu.memory_space<vmem>>, vector<1x16xf32>
    %37 = vector.broadcast %36 : vector<1x16xf32> to vector<8x16xf32>
    %38 = arith.addf %35, %37 : vector<8x16xf32>
    %39 = arith.addf %38, %33 : vector<8x16xf32>
    %cst_40 = arith.constant 0.000000e+00 : f32
    %40 = vector.broadcast %cst_40 : f32 to vector<8x16xf32>
    %41 = arith.maximumf %39, %40 : vector<8x16xf32>
    %c0_41 = arith.constant 0 : index
    %c0_42 = arith.constant 0 : index
    %42 = vector.load %arg31[%c0_41, %c0_42] : memref<8x16xf32, #tpu.memory_space<vmem>>, vector<8x16xf32>
    tpu.vector_store %arg31[%c0_41, %c0_42], %41 {strides = array<i32>} : memref<8x16xf32, #tpu.memory_space<vmem>>, vector<8x16xf32>,
    %43 = arith.index_cast %arg0 : i32 to index
    %c0_43 = arith.constant 0 : index
    %44 = memref.load %arg1[%43, %c0_43] : memref<2x4xi32, #tpu.memory_space<smem>>
    %45 = arith.index_cast %arg0 : i32 to index
    %c0_44 = arith.constant 0 : index
    %46 = memref.load %arg2[%45, %c0_44] : memref<2x4xi32, #tpu.memory_space<smem>>
    %47 = arith.sitofp %46 : i32 to f32
    %48 = arith.index_cast %44 : i32 to index
    %c0_45 = arith.constant 0 : index
    %49 = vector.load %arg31[%48, %c0_45] : memref<8x16xf32, #tpu.memory_space<vmem>>, vector<1x16xf32>
    %50 = vector.broadcast %47 : f32 to vector<1x16xf32>
    %51 = arith.mulf %49, %50 : vector<1x16xf32>
    %cst_46 = arith.constant 1.000000e+00 : f32
    %52 = arith.subf %47, %cst_46 : f32
    %53 = vector.broadcast %52 : f32 to vector<1x16xf32>
    %54 = arith.addf %51, %53 : vector<1x16xf32>
    %c0_47 = arith.constant 0 : index
    %c0_48 = arith.constant 0 : index
    %55 = vector.load %arg32[%c0_47, %c0_48] : memref<1x64xf32, #tpu.memory_space<vmem>>, vector<1x16xf32>
    tpu.vector_store %arg32[%c0_47, %c0_48], %54 {strides = array<i32>} : memref<1x64xf32, #tpu.memory_space<vmem>>, vector<1x16xf32>,
    %56 = arith.index_cast %arg0 : i32 to index
    %c1 = arith.constant 1 : index
    %57 = memref.load %arg1[%56, %c1] : memref<2x4xi32, #tpu.memory_space<smem>>
    %58 = arith.index_cast %arg0 : i32 to index
    %c1_49 = arith.constant 1 : index
    %59 = memref.load %arg2[%58, %c1_49] : memref<2x4xi32, #tpu.memory_space<smem>>
    %60 = arith.sitofp %59 : i32 to f32
    %61 = arith.index_cast %57 : i32 to index
    %c0_50 = arith.constant 0 : index
    %62 = vector.load %arg31[%61, %c0_50] : memref<8x16xf32, #tpu.memory_space<vmem>>, vector<1x16xf32>
    %63 = vector.broadcast %60 : f32 to vector<1x16xf32>
    %64 = arith.mulf %62, %63 : vector<1x16xf32>
    %cst_51 = arith.constant 1.000000e+00 : f32
    %65 = arith.subf %60, %cst_51 : f32
    %66 = vector.broadcast %65 : f32 to vector<1x16xf32>
    %67 = arith.addf %64, %66 : vector<1x16xf32>
    %c0_52 = arith.constant 0 : index
    %c16 = arith.constant 16 : index
    %68 = vector.load %arg32[%c0_52, %c16] : memref<1x64xf32, #tpu.memory_space<vmem>>, vector<1x16xf32>
    tpu.vector_store %arg32[%c0_52, %c16], %67 {strides = array<i32>} : memref<1x64xf32, #tpu.memory_space<vmem>>, vector<1x16xf32>,
    %69 = arith.index_cast %arg0 : i32 to index
    %c2 = arith.constant 2 : index
    %70 = memref.load %arg1[%69, %c2] : memref<2x4xi32, #tpu.memory_space<smem>>
    %71 = arith.index_cast %arg0 : i32 to index
    %c2_53 = arith.constant 2 : index
    %72 = memref.load %arg2[%71, %c2_53] : memref<2x4xi32, #tpu.memory_space<smem>>
    %73 = arith.sitofp %72 : i32 to f32
    %74 = arith.index_cast %70 : i32 to index
    %c0_54 = arith.constant 0 : index
    %75 = vector.load %arg31[%74, %c0_54] : memref<8x16xf32, #tpu.memory_space<vmem>>, vector<1x16xf32>
    %76 = vector.broadcast %73 : f32 to vector<1x16xf32>
    %77 = arith.mulf %75, %76 : vector<1x16xf32>
    %cst_55 = arith.constant 1.000000e+00 : f32
    %78 = arith.subf %73, %cst_55 : f32
    %79 = vector.broadcast %78 : f32 to vector<1x16xf32>
    %80 = arith.addf %77, %79 : vector<1x16xf32>
    %c0_56 = arith.constant 0 : index
    %c32 = arith.constant 32 : index
    %81 = vector.load %arg32[%c0_56, %c32] : memref<1x64xf32, #tpu.memory_space<vmem>>, vector<1x16xf32>
    tpu.vector_store %arg32[%c0_56, %c32], %80 {strides = array<i32>} : memref<1x64xf32, #tpu.memory_space<vmem>>, vector<1x16xf32>,
    %82 = arith.index_cast %arg0 : i32 to index
    %c3 = arith.constant 3 : index
    %83 = memref.load %arg1[%82, %c3] : memref<2x4xi32, #tpu.memory_space<smem>>
    %84 = arith.index_cast %arg0 : i32 to index
    %c3_57 = arith.constant 3 : index
    %85 = memref.load %arg2[%84, %c3_57] : memref<2x4xi32, #tpu.memory_space<smem>>
    %86 = arith.sitofp %85 : i32 to f32
    %87 = arith.index_cast %83 : i32 to index
    %c0_58 = arith.constant 0 : index
    %88 = vector.load %arg31[%87, %c0_58] : memref<8x16xf32, #tpu.memory_space<vmem>>, vector<1x16xf32>
    %89 = vector.broadcast %86 : f32 to vector<1x16xf32>
    %90 = arith.mulf %88, %89 : vector<1x16xf32>
    %cst_59 = arith.constant 1.000000e+00 : f32
    %91 = arith.subf %86, %cst_59 : f32
    %92 = vector.broadcast %91 : f32 to vector<1x16xf32>
    %93 = arith.addf %90, %92 : vector<1x16xf32>
    %c0_60 = arith.constant 0 : index
    %c48 = arith.constant 48 : index
    %94 = vector.load %arg32[%c0_60, %c48] : memref<1x64xf32, #tpu.memory_space<vmem>>, vector<1x16xf32>
    tpu.vector_store %arg32[%c0_60, %c48], %93 {strides = array<i32>} : memref<1x64xf32, #tpu.memory_space<vmem>>, vector<1x16xf32>,
    %c0_61 = arith.constant 0 : index
    %c0_62 = arith.constant 0 : index
    %95 = vector.load %arg32[%c0_61, %c0_62] : memref<1x64xf32, #tpu.memory_space<vmem>>, vector<1x64xf32>
    %c0_63 = arith.constant 0 : index
    %c0_64 = arith.constant 0 : index
    %96 = vector.load %arg18[%c0_63, %c0_64] : memref<64x16xf32, #tpu.memory_space<vmem>>, vector<64x16xf32>
    %cst_65 = arith.constant dense<0.000000e+00> : vector<1x16xf32>
    %97 = tpu.matmul %5, %96, %cst_65 {dimension_numbers = #tpu.dot_dimension_numbers<[1], [0], [0], [1], [0, 0, 1, 1], [], []>} : vector<1x64xf32>, vector<64x16xf32>, vector<1x16xf32> -> vector<1x16xf32>
    %c0_66 = arith.constant 0 : index
    %c0_67 = arith.constant 0 : index
    %98 = vector.load %arg19[%c0_66, %c0_67] : memref<64x16xf32, #tpu.memory_space<vmem>>, vector<64x16xf32>
    %cst_68 = arith.constant dense<0.000000e+00> : vector<1x16xf32>
    %99 = tpu.matmul %95, %98, %cst_68 {dimension_numbers = #tpu.dot_dimension_numbers<[1], [0], [0], [1], [0, 0, 1, 1], [], []>} : vector<1x64xf32>, vector<64x16xf32>, vector<1x16xf32> -> vector<1x16xf32>
    %100 = arith.addf %97, %99 : vector<1x16xf32>
    %c0_69 = arith.constant 0 : index
    %c0_70 = arith.constant 0 : index
    %101 = vector.load %arg20[%c0_69, %c0_70] : memref<1x16xf32, #tpu.memory_space<vmem>>, vector<1x16xf32>
    %102 = arith.addf %100, %101 : vector<1x16xf32>
    %c0_71 = arith.constant 0 : index
    %c0_72 = arith.constant 0 : index
    %103 = vector.load %arg21[%c0_71, %c0_72] : memref<64x16xf32, #tpu.memory_space<vmem>>, vector<64x16xf32>
    %cst_73 = arith.constant dense<0.000000e+00> : vector<1x16xf32>
    %104 = tpu.matmul %5, %103, %cst_73 {dimension_numbers = #tpu.dot_dimension_numbers<[1], [0], [0], [1], [0, 0, 1, 1], [], []>} : vector<1x64xf32>, vector<64x16xf32>, vector<1x16xf32> -> vector<1x16xf32>
    %c0_74 = arith.constant 0 : index
    %c0_75 = arith.constant 0 : index
    %105 = vector.load %arg22[%c0_74, %c0_75] : memref<64x16xf32, #tpu.memory_space<vmem>>, vector<64x16xf32>
    %cst_76 = arith.constant dense<0.000000e+00> : vector<1x16xf32>
    %106 = tpu.matmul %95, %105, %cst_76 {dimension_numbers = #tpu.dot_dimension_numbers<[1], [0], [0], [1], [0, 0, 1, 1], [], []>} : vector<1x64xf32>, vector<64x16xf32>, vector<1x16xf32> -> vector<1x16xf32>
    %107 = arith.addf %104, %106 : vector<1x16xf32>
    %c0_77 = arith.constant 0 : index
    %c0_78 = arith.constant 0 : index
    %108 = vector.load %arg23[%c0_77, %c0_78] : memref<1x16xf32, #tpu.memory_space<vmem>>, vector<1x16xf32>
    %109 = arith.addf %107, %108 : vector<1x16xf32>
    %110 = arith.negf %109 : vector<1x16xf32>
    %111 = math.exp %110 : vector<1x16xf32>
    %cst_79 = arith.constant 1.000000e+00 : f32
    %112 = vector.broadcast %cst_79 : f32 to vector<1x16xf32>
    %113 = arith.addf %112, %111 : vector<1x16xf32>
    %114 = arith.divf %112, %113 : vector<1x16xf32>
    %115 = arith.mulf %102, %114 : vector<1x16xf32>
    %c0_80 = arith.constant 0 : index
    %c0_81 = arith.constant 0 : index
    %116 = vector.load %arg24[%c0_80, %c0_81] : memref<16x32xf32, #tpu.memory_space<vmem>>, vector<16x32xf32>
    %cst_82 = arith.constant dense<0.000000e+00> : vector<1x32xf32>
    %117 = tpu.matmul %115, %116, %cst_82 {dimension_numbers = #tpu.dot_dimension_numbers<[1], [0], [0], [1], [0, 0, 1, 1], [], []>} : vector<1x16xf32>, vector<16x32xf32>, vector<1x32xf32> -> vector<1x32xf32>
    %c0_83 = arith.constant 0 : index
    %c0_84 = arith.constant 0 : index
    %118 = vector.load %arg25[%c0_83, %c0_84] : memref<1x32xf32, #tpu.memory_space<vmem>>, vector<1x32xf32>
    %119 = arith.addf %117, %118 : vector<1x32xf32>
    %cst_85 = arith.constant 0.000000e+00 : f32
    %120 = vector.broadcast %cst_85 : f32 to vector<1x32xf32>
    %121 = arith.maximumf %119, %120 : vector<1x32xf32>
    %c0_86 = arith.constant 0 : index
    %c0_87 = arith.constant 0 : index
    %122 = vector.load %arg26[%c0_86, %c0_87] : memref<32x32xf32, #tpu.memory_space<vmem>>, vector<32x32xf32>
    %cst_88 = arith.constant dense<0.000000e+00> : vector<1x32xf32>
    %123 = tpu.matmul %121, %122, %cst_88 {dimension_numbers = #tpu.dot_dimension_numbers<[1], [0], [0], [1], [0, 0, 1, 1], [], []>} : vector<1x32xf32>, vector<32x32xf32>, vector<1x32xf32> -> vector<1x32xf32>
    %c0_89 = arith.constant 0 : index
    %c0_90 = arith.constant 0 : index
    %124 = vector.load %arg27[%c0_89, %c0_90] : memref<1x32xf32, #tpu.memory_space<vmem>>, vector<1x32xf32>
    %125 = arith.addf %123, %124 : vector<1x32xf32>
    %cst_91 = arith.constant 0.000000e+00 : f32
    %126 = vector.broadcast %cst_91 : f32 to vector<1x32xf32>
    %127 = arith.maximumf %125, %126 : vector<1x32xf32>
    %c0_92 = arith.constant 0 : index
    %c0_93 = arith.constant 0 : index
    %128 = vector.load %arg28[%c0_92, %c0_93] : memref<32x4xf32, #tpu.memory_space<vmem>>, vector<32x4xf32>
    %cst_94 = arith.constant dense<0.000000e+00> : vector<1x4xf32>
    %129 = tpu.matmul %127, %128, %cst_94 {dimension_numbers = #tpu.dot_dimension_numbers<[1], [0], [0], [1], [0, 0, 1, 1], [], []>} : vector<1x32xf32>, vector<32x4xf32>, vector<1x4xf32> -> vector<1x4xf32>
    %c0_95 = arith.constant 0 : index
    %c0_96 = arith.constant 0 : index
    %130 = vector.load %arg29[%c0_95, %c0_96] : memref<1x4xf32, #tpu.memory_space<vmem>>, vector<1x4xf32>
    %131 = arith.addf %129, %130 : vector<1x4xf32>
    %c0_97 = arith.constant 0 : index
    %c0_98 = arith.constant 0 : index
    %c0_99 = arith.constant 0 : index
    %132 = vector.load %arg30[%c0_97, %c0_98, %c0_99] : memref<1x1x4xf32, #tpu.memory_space<vmem>>, vector<1x1x4xf32>
    %133 = vector.shape_cast %132 : vector<1x1x4xf32> to vector<1x4xf32>
    %134 = vector.shape_cast %131 : vector<1x4xf32> to vector<1x1x4xf32>
    tpu.vector_store %arg30[%c0_97, %c0_98, %c0_99], %134 {strides = array<i32>} : memref<1x1x4xf32, #tpu.memory_space<vmem>>, vector<1x1x4xf32>,
    return
  }
  func.func @transform_0(%arg0: i32, %arg1: memref<2x4xi32, #tpu.memory_space<smem>>, %arg2: memref<2x4xi32, #tpu.memory_space<smem>>) -> (i32, i32, i32) {
    %c0_i32 = arith.constant 0 : i32
    %c0_i32_0 = arith.constant 0 : i32
    %c0_i32_1 = arith.constant 0 : i32
    return %arg0, %c0_i32, %c0_i32_0 : i32, i32, i32
  }
  func.func @transform_1(%arg0: i32, %arg1: memref<2x4xi32, #tpu.memory_space<smem>>, %arg2: memref<2x4xi32, #tpu.memory_space<smem>>) -> (i32, i32, i32) {
    %c0_i32 = arith.constant 0 : i32
    %c0_i32_0 = arith.constant 0 : i32
    %c0_i32_1 = arith.constant 0 : i32
    return %arg0, %c0_i32, %c0_i32_0 : i32, i32, i32
  }
  func.func @transform_2(%arg0: i32, %arg1: memref<2x4xi32, #tpu.memory_space<smem>>, %arg2: memref<2x4xi32, #tpu.memory_space<smem>>) -> (i32, i32, i32) {
    %c0_i32 = arith.constant 0 : i32
    %c0_i32_0 = arith.constant 0 : i32
    %c0_i32_1 = arith.constant 0 : i32
    return %arg0, %c0_i32, %c0_i32_0 : i32, i32, i32
  }
  func.func @transform_3(%arg0: i32, %arg1: memref<2x4xi32, #tpu.memory_space<smem>>, %arg2: memref<2x4xi32, #tpu.memory_space<smem>>) -> (i32, i32) {
    %c0_i32 = arith.constant 0 : i32
    %c0_i32_0 = arith.constant 0 : i32
    %c0_i32_1 = arith.constant 0 : i32
    return %c0_i32, %c0_i32_0 : i32, i32
  }
  func.func @transform_4(%arg0: i32, %arg1: memref<2x4xi32, #tpu.memory_space<smem>>, %arg2: memref<2x4xi32, #tpu.memory_space<smem>>) -> (i32, i32) {
    %c0_i32 = arith.constant 0 : i32
    %c0_i32_0 = arith.constant 0 : i32
    %c0_i32_1 = arith.constant 0 : i32
    return %c0_i32, %c0_i32_0 : i32, i32
  }
  func.func @transform_5(%arg0: i32, %arg1: memref<2x4xi32, #tpu.memory_space<smem>>, %arg2: memref<2x4xi32, #tpu.memory_space<smem>>) -> (i32, i32) {
    %c0_i32 = arith.constant 0 : i32
    %c0_i32_0 = arith.constant 0 : i32
    %c0_i32_1 = arith.constant 0 : i32
    return %c0_i32, %c0_i32_0 : i32, i32
  }
  func.func @transform_6(%arg0: i32, %arg1: memref<2x4xi32, #tpu.memory_space<smem>>, %arg2: memref<2x4xi32, #tpu.memory_space<smem>>) -> (i32, i32) {
    %c0_i32 = arith.constant 0 : i32
    %c0_i32_0 = arith.constant 0 : i32
    %c0_i32_1 = arith.constant 0 : i32
    return %c0_i32, %c0_i32_0 : i32, i32
  }
  func.func @transform_7(%arg0: i32, %arg1: memref<2x4xi32, #tpu.memory_space<smem>>, %arg2: memref<2x4xi32, #tpu.memory_space<smem>>) -> (i32, i32) {
    %c0_i32 = arith.constant 0 : i32
    %c0_i32_0 = arith.constant 0 : i32
    %c0_i32_1 = arith.constant 0 : i32
    return %c0_i32, %c0_i32_0 : i32, i32
  }
  func.func @transform_8(%arg0: i32, %arg1: memref<2x4xi32, #tpu.memory_space<smem>>, %arg2: memref<2x4xi32, #tpu.memory_space<smem>>) -> (i32, i32) {
    %c0_i32 = arith.constant 0 : i32
    %c0_i32_0 = arith.constant 0 : i32
    %c0_i32_1 = arith.constant 0 : i32
    return %c0_i32, %c0_i32_0 : i32, i32
  }
  func.func @transform_9(%arg0: i32, %arg1: memref<2x4xi32, #tpu.memory_space<smem>>, %arg2: memref<2x4xi32, #tpu.memory_space<smem>>) -> (i32, i32) {
    %c0_i32 = arith.constant 0 : i32
    %c0_i32_0 = arith.constant 0 : i32
    %c0_i32_1 = arith.constant 0 : i32
    return %c0_i32, %c0_i32_0 : i32, i32
  }
  func.func @transform_10(%arg0: i32, %arg1: memref<2x4xi32, #tpu.memory_space<smem>>, %arg2: memref<2x4xi32, #tpu.memory_space<smem>>) -> (i32, i32) {
    %c0_i32 = arith.constant 0 : i32
    %c0_i32_0 = arith.constant 0 : i32
    %c0_i32_1 = arith.constant 0 : i32
    return %c0_i32, %c0_i32_0 : i32, i32
  }
  func.func @transform_11(%arg0: i32, %arg1: memref<2x4xi32, #tpu.memory_space<smem>>, %arg2: memref<2x4xi32, #tpu.memory_space<smem>>) -> (i32, i32) {
    %c0_i32 = arith.constant 0 : i32
    %c0_i32_0 = arith.constant 0 : i32
    %c0_i32_1 = arith.constant 0 : i32
    return %c0_i32, %c0_i32_0 : i32, i32
  }
  func.func @transform_12(%arg0: i32, %arg1: memref<2x4xi32, #tpu.memory_space<smem>>, %arg2: memref<2x4xi32, #tpu.memory_space<smem>>) -> (i32, i32) {
    %c0_i32 = arith.constant 0 : i32
    %c0_i32_0 = arith.constant 0 : i32
    %c0_i32_1 = arith.constant 0 : i32
    return %c0_i32, %c0_i32_0 : i32, i32
  }
  func.func @transform_13(%arg0: i32, %arg1: memref<2x4xi32, #tpu.memory_space<smem>>, %arg2: memref<2x4xi32, #tpu.memory_space<smem>>) -> (i32, i32) {
    %c0_i32 = arith.constant 0 : i32
    %c0_i32_0 = arith.constant 0 : i32
    %c0_i32_1 = arith.constant 0 : i32
    return %c0_i32, %c0_i32_0 : i32, i32
  }
  func.func @transform_14(%arg0: i32, %arg1: memref<2x4xi32, #tpu.memory_space<smem>>, %arg2: memref<2x4xi32, #tpu.memory_space<smem>>) -> (i32, i32) {
    %c0_i32 = arith.constant 0 : i32
    %c0_i32_0 = arith.constant 0 : i32
    %c0_i32_1 = arith.constant 0 : i32
    return %c0_i32, %c0_i32_0 : i32, i32
  }
  func.func @transform_15(%arg0: i32, %arg1: memref<2x4xi32, #tpu.memory_space<smem>>, %arg2: memref<2x4xi32, #tpu.memory_space<smem>>) -> (i32, i32) {
    %c0_i32 = arith.constant 0 : i32
    %c0_i32_0 = arith.constant 0 : i32
    %c0_i32_1 = arith.constant 0 : i32
    return %c0_i32, %c0_i32_0 : i32, i32
  }
  func.func @transform_16(%arg0: i32, %arg1: memref<2x4xi32, #tpu.memory_space<smem>>, %arg2: memref<2x4xi32, #tpu.memory_space<smem>>) -> (i32, i32) {
    %c0_i32 = arith.constant 0 : i32
    %c0_i32_0 = arith.constant 0 : i32
    %c0_i32_1 = arith.constant 0 : i32
    return %c0_i32, %c0_i32_0 : i32, i32
  }
  func.func @transform_17(%arg0: i32, %arg1: memref<2x4xi32, #tpu.memory_space<smem>>, %arg2: memref<2x4xi32, #tpu.memory_space<smem>>) -> (i32, i32) {
    %c0_i32 = arith.constant 0 : i32
    %c0_i32_0 = arith.constant 0 : i32
    %c0_i32_1 = arith.constant 0 : i32
    return %c0_i32, %c0_i32_0 : i32, i32
  }
  func.func @transform_18(%arg0: i32, %arg1: memref<2x4xi32, #tpu.memory_space<smem>>, %arg2: memref<2x4xi32, #tpu.memory_space<smem>>) -> (i32, i32) {
    %c0_i32 = arith.constant 0 : i32
    %c0_i32_0 = arith.constant 0 : i32
    %c0_i32_1 = arith.constant 0 : i32
    return %c0_i32, %c0_i32_0 : i32, i32
  }
  func.func @transform_19(%arg0: i32, %arg1: memref<2x4xi32, #tpu.memory_space<smem>>, %arg2: memref<2x4xi32, #tpu.memory_space<smem>>) -> (i32, i32) {
    %c0_i32 = arith.constant 0 : i32
    %c0_i32_0 = arith.constant 0 : i32
    %c0_i32_1 = arith.constant 0 : i32
    return %c0_i32, %c0_i32_0 : i32, i32
  }
  func.func @transform_20(%arg0: i32, %arg1: memref<2x4xi32, #tpu.memory_space<smem>>, %arg2: memref<2x4xi32, #tpu.memory_space<smem>>) -> (i32, i32) {
    %c0_i32 = arith.constant 0 : i32
    %c0_i32_0 = arith.constant 0 : i32
    %c0_i32_1 = arith.constant 0 : i32
    return %c0_i32, %c0_i32_0 : i32, i32
  }
  func.func @transform_21(%arg0: i32, %arg1: memref<2x4xi32, #tpu.memory_space<smem>>, %arg2: memref<2x4xi32, #tpu.memory_space<smem>>) -> (i32, i32) {
    %c0_i32 = arith.constant 0 : i32
    %c0_i32_0 = arith.constant 0 : i32
    %c0_i32_1 = arith.constant 0 : i32
    return %c0_i32, %c0_i32_0 : i32, i32
  }
  func.func @transform_22(%arg0: i32, %arg1: memref<2x4xi32, #tpu.memory_space<smem>>, %arg2: memref<2x4xi32, #tpu.memory_space<smem>>) -> (i32, i32) {
    %c0_i32 = arith.constant 0 : i32
    %c0_i32_0 = arith.constant 0 : i32
    %c0_i32_1 = arith.constant 0 : i32
    return %c0_i32, %c0_i32_0 : i32, i32
  }
  func.func @transform_23(%arg0: i32, %arg1: memref<2x4xi32, #tpu.memory_space<smem>>, %arg2: memref<2x4xi32, #tpu.memory_space<smem>>) -> (i32, i32) {
    %c0_i32 = arith.constant 0 : i32
    %c0_i32_0 = arith.constant 0 : i32
    %c0_i32_1 = arith.constant 0 : i32
    return %c0_i32, %c0_i32_0 : i32, i32
  }
  func.func @transform_24(%arg0: i32, %arg1: memref<2x4xi32, #tpu.memory_space<smem>>, %arg2: memref<2x4xi32, #tpu.memory_space<smem>>) -> (i32, i32) {
    %c0_i32 = arith.constant 0 : i32
    %c0_i32_0 = arith.constant 0 : i32
    %c0_i32_1 = arith.constant 0 : i32
    return %c0_i32, %c0_i32_0 : i32, i32
  }
  func.func @transform_25(%arg0: i32, %arg1: memref<2x4xi32, #tpu.memory_space<smem>>, %arg2: memref<2x4xi32, #tpu.memory_space<smem>>) -> (i32, i32) {
    %c0_i32 = arith.constant 0 : i32
    %c0_i32_0 = arith.constant 0 : i32
    %c0_i32_1 = arith.constant 0 : i32
    return %c0_i32, %c0_i32_0 : i32, i32
  }
  func.func @transform_26(%arg0: i32, %arg1: memref<2x4xi32, #tpu.memory_space<smem>>, %arg2: memref<2x4xi32, #tpu.memory_space<smem>>) -> (i32, i32) {
    %c0_i32 = arith.constant 0 : i32
    %c0_i32_0 = arith.constant 0 : i32
    %c0_i32_1 = arith.constant 0 : i32
    return %c0_i32, %c0_i32_0 : i32, i32
  }
  func.func @transform_27(%arg0: i32, %arg1: memref<2x4xi32, #tpu.memory_space<smem>>, %arg2: memref<2x4xi32, #tpu.memory_space<smem>>) -> (i32, i32, i32) {
    %c0_i32 = arith.constant 0 : i32
    %c0_i32_0 = arith.constant 0 : i32
    %c0_i32_1 = arith.constant 0 : i32
    return %arg0, %c0_i32, %c0_i32_0 : i32, i32, i32
  }
}

</mosaic_0001>

<bundles_post_ra>
// kernel: an_model_forward.1
= control target key start
LH: loop header
LB: loop body
LE: loop exit
PB: predicated region body
PF: predicated region fallthrough
CT: control target
= control target key end

     0   :  { %s1753_s6 = smov 2   ;;  %s1754_s10 = smov 3   ;;  %s2102_s0 = inlined_call_operand.smem [shape: u32[30], index: -1, kind: input, shape index: {}] }
   0x1   :  { %s1795_s5 = sld [smem:[%s2102_s0]]   ;;  %s1755_s14 = smov 4  }
   0x2   :  { %s1800_s9 = sld [smem:[%s2102_s0 + %s1753_s6]]   ;;  %s1756_s18 = smov 5  }
   0x3   :  { %s1805_s13 = sld [smem:[%s2102_s0 + %s1754_s10]]   ;;  %s1757_s22 = smov 6  }
   0x4   :  { %s1810_s17 = sld [smem:[%s2102_s0 + %s1755_s14]]   ;;  %s1758_s26 = smov 7  }
   0x5   :  { %s1815_s21 = sld [smem:[%s2102_s0 + %s1756_s18]]   ;;  %s1759_s30 = smov 8  }
   0x6   :  { %s1820_s25 = sld [smem:[%s2102_s0 + %s1757_s22]]   ;;  %s1760_s4 = smov 9  }
   0x7   :  { %s1825_s29 = sld [smem:[%s2102_s0 + %s1758_s26]]   ;;  %s1761_s10 = smov 10  }
   0x8   :  { %2114 = sst [smem:[#allocation11_spill]] %s1800_s9  ;;  %s1762_s15 = smov 11  }
   0x9   :  { %2115 = sst [smem:[#allocation12_spill]] %s1805_s13  ;;  %s1763_s20 = smov 12  }
   0xa   :  { %2116 = sst [smem:[#allocation13_spill]] %s1810_s17  ;;  %s1764_s26 = smov 13  }
   0xb   :  { %2117 = sst [smem:[#allocation14_spill]] %s1815_s21  ;;  %s1765_s1 = smov 14  }
   0xc   :  { %2118 = sst [smem:[#allocation15_spill]] %s1820_s25  ;;  %s1766_s7 = smov 15  }
   0xd   :  { %2119 = sst [smem:[#allocation16_spill]] %s1825_s29  ;;  %s1768_s22 = smov 17  }
   0xe   :  { %s1830_s3 = sld [smem:[%s2102_s0 + %s1759_s30]]   ;;  %s1769_s28 = smov 18  }
   0xf   :  { %s1835_s8 = sld [smem:[%s2102_s0 + %s1760_s4]]   ;;  %s1779_s18 = smov 28  }
  0x10   :  { %s1840_s14 = sld [smem:[%s2102_s0 + %s1761_s10]]  }
  0x11   :  { %s1845_s19 = sld [smem:[%s2102_s0 + %s1762_s15]]   ;;  %s1767_s15 = smov 16  }
  0x12   :  { %s1850_s24 = sld [smem:[%s2102_s0 + %s1763_s20]]  }
  0x13   :  { %s1855_s30 = sld [smem:[%s2102_s0 + %s1764_s26]]   ;;  %s1780_s26 = smov 29  }
  0x14   :  { %2120 = sst [smem:[#allocation17_spill]] %s1830_s3 }
  0x15   :  { %2121 = sst [smem:[#allocation18_spill]] %s1835_s8 }
  0x16   :  { %2122 = sst [smem:[#allocation19_spill]] %s1840_s14 }
  0x17   :  { %2123 = sst [smem:[#allocation20_spill]] %s1845_s19 }
  0x18   :  { %2124 = sst [smem:[#allocation21_spill]] %s1850_s24 }
  0x19   :  { %s1860_s6 = sld [smem:[%s2102_s0 + %s1765_s1]]  }
  0x1a   :  { %s1865_s12 = sld [smem:[%s2102_s0 + %s1766_s7]]   ;;  %s1770_s7 = smov 19  }
  0x1b   :  { %s1870_s20 = sld [smem:[%s2102_s0 + %s1767_s15]]   ;;  %s1771_s15 = smov 20  }
  0x1c   :  { %s1875_s27 = sld [smem:[%s2102_s0 + %s1768_s22]]   ;;  %s1772_s22 = smov 21  }
  0x1d   :  { %s1880_s4 = sld [smem:[%s2102_s0 + %s1769_s28]]   ;;  %s1773_s28 = smov 22  }
  0x1e   :  { %s1885_s24 = sld [smem:[%s2102_s0 + %s1770_s7]]   ;;  %s1774_s7 = smov 23  }
  0x1f   :  { %2125 = sst [smem:[#allocation22_spill]] %s1860_s6 }
  0x20   :  { %2126 = sst [smem:[#allocation23_spill]] %s1865_s12 }
  0x21   :  { %2127 = sst [smem:[#allocation24_spill]] %s1870_s20  ;;  %s1776_s20 = smov 25  }
  0x22   :  { %2128 = sst [smem:[#allocation25_spill]] %s1875_s27 }
  0x23   :  { %2129 = sst [smem:[#allocation26_spill]] %s1880_s4 }
  0x24   :  { %2130 = sst [smem:[#allocation27_spill]] %s1885_s24 }
  0x25   :  { %s1890_s23 = sld [smem:[%s2102_s0 + %s1771_s15]]   ;;  %s1775_s15 = smov 24  }
  0x26   :  { %s1895_s1 = sld [smem:[%s2102_s0 + %s1772_s22]]  }
  0x27   :  { %s1900_s10 = sld [smem:[%s2102_s0 + %s1773_s28]]   ;;  %s1777_s28 = smov 26  }
  0x28   :  { %s1905_s16 = sld [smem:[%s2102_s0 + %s1774_s7]]   ;;  %s1778_s7 = smov 27  }
  0x29   :  { %s1915_s4 = sld [smem:[%s2102_s0 + %s1776_s20]]  }
  0x2a   :  { %s1920_s24 = sld [smem:[%s2102_s0 + %s1777_s28]]  }
  0x2b   :  { %2131 = sst [smem:[#allocation28_spill]] %s1890_s23 }
  0x2c   :  { %2132 = sst [smem:[#allocation29_spill]] %s1895_s1 }
  0x2d   :  { %2133 = sst [smem:[#allocation30_spill]] %s1900_s10 }
  0x2e   :  { %2134 = sst [smem:[#allocation31_spill]] %s1905_s16  ;;  %s1667_s16 = scalar_lea.vmem %s1795_s5, 2 }
  0x2f   :  { %s1910_s23 = sld [smem:[%s2102_s0 + %s1775_s15]]   ;;  %s65_s15 = sshll.u32 %s1795_s5, 4  ;;  %s66_s15 = int_to_ptr.vmem [resolvable:$true] %s65_s15 }
  0x30   :  { %2136 = sst [smem:[#allocation33_spill]] %s1915_s4  ;;  %s1663_s28 = sshra.s32 %s66_s15, 4  ;;  %s1664_s28 = int_to_ptr.vmem [resolvable:$true] %s1663_s28 }
  0x31   :  { %s1925_s3 = sld [smem:[%s2102_s0 + %s1778_s7]]   ;;  %s1665_s2 = scalar_lea.vmem %s1664_s28, 2 }
  0x32   :  { %s1931_s20 = sld [smem:[%s2102_s0 + %s1779_s18]]   ;;  %p1666_p0 = scmp.ne.s32.totalorder %s1664_s28, %s1665_s2 }
  0x33   :  { %s1936_s10 = sld [smem:[%s2102_s0 + %s1780_s26]]   ;;  %p1668_p1 = scmp.lt.s32.totalorder %s1664_s28, %s1795_s5 }
  0x34   :  { %p1669_p2 = scmp.lt.s32.totalorder %s1667_s16, %s1665_s2 }
  0x35   :  { %2135 = sst [smem:[#allocation32_spill]] %s1910_s23 }
  0x36   :  { %p1670_p3 = por %p1669_p2, %p1668_p1 }
  0x38   :  { %2137 = sst [smem:[#allocation34_spill]] %s1931_s20  ;;  %p1671_p4 = pnand %p1670_p3, %p1666_p0 }
  0x3a   :  { %1674 = shalt.err (!%p1671_p4)  }
  0x3b   :  { %s1781_s23 = smov [#allocation5]   ;;  %s1782_s7 = smov 1  }
  0x3c   :  { %68 = dma.vmem_to_smem %s66_s15, 32, %s1781_s23, [#allocation4] }
  0x3d   :  { %s1519_s22 = sld [smem:[%s2102_s0 + %s1782_s7]]  }
  0x43   :  { %s70_s1 = sshll.u32 %s1519_s22, 4  ;;  %s1679_s20 = scalar_lea.vmem %s1519_s22, 2  ;;  %s71_s1 = int_to_ptr.vmem [resolvable:$true] %s70_s1 }
  0x44   :  { %s1675_s4 = sshra.s32 %s71_s1, 4  ;;  %s1676_s4 = int_to_ptr.vmem [resolvable:$true] %s1675_s4 }
  0x45   :  { %s1677_s26 = scalar_lea.vmem %s1676_s4, 2  ;;  %p1680_p6 = scmp.lt.s32.totalorder %s1676_s4, %s1519_s22 }
  0x46   :  { %p1678_p5 = scmp.ne.s32.totalorder %s1676_s4, %s1677_s26  ;;  %p1681_p7 = scmp.lt.s32.totalorder %s1679_s20, %s1677_s26 }
  0x48   :  { %p1682_p8 = por %p1681_p7, %p1680_p6 }
  0x4a   :  { %p1683_p9 = pnand %p1682_p8, %p1678_p5 }
  0x4c   :  { %1686 = shalt.err (!%p1683_p9)  }
  0x4d   :  { %s1783_s5 = smov [#allocation6]  }
  0x4e   :  { %73 = dma.vmem_to_smem %s71_s1, 32, %s1783_s5, [#allocation4] }
  0x4f   :  { %1731 = dma.done.wait [#allocation4], 64 }
  0x50   :  { %1732 = vsyncadd [#allocation4], 4294967232 }
  0x51   :  { %76 = sfence }
  0x52   :  { %77 = vsyncpa [#allocation8], 0 }
  0x53   :  { %79 = vsyncpa [#allocation8 + $0x1], 0  ;;  %s1943_s0 = smov 0   ;;  %s1945_s15 = smov 0  }
  0x54   :  { %s1947_s28 = smov 0   ;;  %s1949_s2 = smov 0  }
  0x55 LB: > { %s2138_s29 = sld [smem:[#allocation16_spill]]  ;;  %s1964_s20 = sadd.s32 4294967295, %s1751_s2   ;;  %s1739_s0 = sphi %s1943_s0, %s2164_s0   ;;  %s1751_s2 = sphi %s1949_s2, %s2167_s2   ;;  %s1747_s28 = sphi %s1947_s28, %s2166_s28   ;;  %s1743_s15 = sphi %s1945_s15, %s2165_s15  }
  0x56   : > { %s2139_s27 = sld [smem:[#allocation25_spill]]  ;;  %s1549_s16 = sadd.s32 4294967294, %s1751_s2  }
  0x57   : > { %s2140_s19 = sld [smem:[#allocation20_spill]]  ;;  %s1968_s23 = sadd.s32 1, %s1751_s2  }
  0x58   : > { %s2141_s8 = sld [smem:[#allocation18_spill]]  ;;  %s674_s7 = sadd.s32 1, %s1747_s28 }
  0x59   : > { %s2142_s6 = sld [smem:[#allocation22_spill]]  ;;  %s671_s11 = ssub.s32 %s1751_s2, %s1968_s23 }
  0x5a   : > { %p684_p10 = scmp.ne.s32.totalorder %s1747_s28, %s1743_s15  ;;  %p672_p11 = scmp.eq.s32.totalorder %s671_s11, 0 }
  0x5b   : > { %p685_p12 = scmp.eq.s32.totalorder %s1964_s20, 1  ;;  %p690_p13 = scmp.ne.s32.totalorder %s1743_s15, %s1739_s0 }
  0x5c   : > { %p691_p0 = scmp.eq.s32.totalorder %s1549_s16, 1  ;;  %p1552_p3 = scmp.ge.s32.totalorder %s1751_s2, 1 }
  0x5d   : > { %s1979_s18 = scalar_select %p672_p11, %s1747_s28, %s674_s7  }
  0x5e   : > { %p1981_p1 = por %p685_p12, %p684_p10  ;;  %p1985_p2 = por %p691_p0, %p690_p13 }
  0x5f   : > { %p802_p4 = scmp.lt.s32.totalorder %s1751_s2, 3 }
  0x61   : > { %p803_p5 = pnand %p1552_p3, %p802_p4 }
  0x62   : > { %s2145_s13 = sld [smem:[#allocation12_spill]] (!%p803_p5)  ;;  %p880_p6 = scmp.lt.s32.totalorder (!%p803_p5), %s1964_s20, 1 }
  0x63   : > { %806 = sbr.rel (%p803_p5) target bundleno = 1210 (0x4ba), region = 128  ;;  %s2146_s17 = sld [smem:[#allocation13_spill]] (!%p803_p5) }
  0x64   : > { %s2147_s9 = sld [smem:[#allocation11_spill]] (!%p803_p5) }
  0x65   : > { %s2148_s25 = sld [smem:[#allocation15_spill]] (!%p803_p5) }
  0x66   : > { %s2149_s21 = sld [smem:[#allocation14_spill]] (!%p803_p5) }
  0x67   : > { %s2150_s12 = sld [smem:[#allocation23_spill]] (!%p803_p5) }
  0x68   : > { %v926_v0 = vld [vmem:[%s2141_s8 + $0x8] sm:$0xf]  ;;  %vm935_vm0 = vcmask 1043456   ;;  %v925_v1 = vld [vmem:[%s2141_s8] sm:$0xff]  ;;  %vm900_vm1 = vcmask 1041408   ;;  %s881_s4 = scalar_select %p880_p6, %s1964_s20, 1 }
  0x69   : > { %1558 = vmatpush.msk.msra.mxu1 %vm935_vm0, %v926_v0  ;;  %v894_v2 = vld [vmem:[%s2138_s29 + $0x8] sm:$0x3]  ;;  %v893_v3 = vld [vmem:[%s2138_s29] sm:$0xff]  ;;  %vm931_vm2 = vcmask 97280   ;;  %vm896_vm3 = vcmask 80896   ;;  %vm973_vm4 = vcmask 523264  }
  0x6a   : > { %1556 = vmatpush.msk.msra.mxu0 %vm900_vm1, %v894_v2  ;;  %s1553_s26 = sshll.u32 %s881_s4, 3  ;;  %s1582_s5 = sshll.u32 %s881_s4, 6  ;;  %v998_v15 = vld [vmem:[%s1855_s30 + $0x8] sm:$0xff]  ;;  %v997_v17 = vld [vmem:[%s1855_s30] sm:$0xff]  ;;  %vm960_vm5 = vcmask 64512   ;;  %vm1079_vm6 = vcmask 1045504  }
  0x6b   : > { %954 = vmatpush.msra.mxu1 %v925_v1  ;;  %s886_s16 = scalar_lea.vmem %s2145_s13, %s1553_s26  ;;  %s891_s7 = scalar_lea.vmem %s2146_s17, %s1582_s5  ;;  %v964_v14 = vld [vmem:[%s2148_s25] sm:$0xff]  ;;  %v1029_v16 = vld [vmem:[%s2142_s6 + $0x8] sm:$0xff]  ;;  %1021 = vmatpush.msra.mxu3 %v998_v15  ;;  %vm1003_vm7 = vcmask 130048   ;;  %v1205_v27 = vld [vmem:[%s2139_s27 + $0x38] sm:$0xff]  ;;  %vm1075_vm8 = vcmask 48128   ;;  %vm1144_vm9 = vcmask 122880  }
  0x6c   : > { %919 = vmatpush.msra.mxu0 %v893_v3  ;;  %v924_v4 = vld [vmem:[%s886_s16] sm:$0xff]  ;;  %v972_v5 = vld [vmem:[%s891_s7 + $0x38] sm:$0xff]  ;;  %v971_v6 = vld [vmem:[%s891_s7 + $0x30] sm:$0xff]  ;;  %s882_s11 = scalar_lea.vmem %s2147_s9, %s881_s4  ;;  %s2151_s14 = sld [smem:[#allocation19_spill]]  ;;  %vm1161_vm10 = vcmask 254080   ;;  %vm1178_vm11 = vcmask 385280  }
  0x6d   : > { %1559 = vmatmul.msk.f32.vlgmr.msra.gmra.mxu1 %vm931_vm2, %v924_v4  ;;  %985 = vmatpush.msra.mxu2 %v972_v5  ;;  %v970_v7 = vld [vmem:[%s891_s7 + $0x28] sm:$0xff]  ;;  %v892_v8 = vld [vmem:[%s882_s11] sm:$0x1]  ;;  %v968_v10 = vld [vmem:[%s891_s7 + $0x18] sm:$0xff]  ;;  %s2152_s4 = sld [smem:[#allocation28_spill]]  ;;  %vm1195_vm12 = vcmask 516480  }
  0x6e   : > { %v969_v9 = vld [vmem:[%s891_s7 + $0x20] sm:$0xff]  ;;  %1557 = vmatmul.msk.f32.vlgmr.msra.gmra.mxu0 %vm896_vm3, %v892_v8  ;;  %v967_v11 = vld [vmem:[%s891_s7 + $0x10] sm:$0xff]  ;;  %v966_v12 = vld [vmem:[%s891_s7 + $0x8] sm:$0xff]  ;;  %1022 = vmatpush.msra.mxu3 %v997_v17  ;;  %s2153_s26 = sld [smem:[#allocation17_spill]]  ;;  %vm1372_vm1 = vcmask 261120   ;;  %vm1425_vm2 = vcmask 24576  }
  0x6f   : > { %986 = vmatpush.msra.mxu2 %v971_v6  ;;  %v965_v13 = vld [vmem:[%s891_s7] sm:$0xff]  ;;  %1044 = vmatpush.msrb.mxu0 %v1029_v16  ;;  %v1105_v19 = vld [vmem:[%s2140_s19 + $0x8] sm:$0xff]  ;;  %v1204_v29 = vld [vmem:[%s2139_s27 + $0x30] sm:$0xff]  ;;  %s2154_s5 = sld [smem:[#allocation24_spill]]  ;;  %s1567_s7 = sshll.u32 %s1964_s20, 7 }
  0x70   : > { %v1028_v18 = vld [vmem:[%s2142_s6] sm:$0xff]  ;;  %v1203_v31 = vld [vmem:[%s2139_s27 + $0x28] sm:$0xff]  ;;  %v1201_v35 = vld [vmem:[%s2139_s27 + $0x18] sm:$0xff]  ;;  %s2155_s16 = sld [smem:[#allocation21_spill]]  ;;  %s1163_s11 = sadd.s32 2, %s1567_s7 }
  0x71   : > { %987 = vmatpush.msra.mxu2 %v970_v7  ;;  %1045 = vmatpush.msrb.mxu0 %v1028_v18  ;;  %v1104_v20 = vld [vmem:[%s2140_s19] sm:$0xff]  ;;  %v1200_v37 = vld [vmem:[%s2139_s27 + $0x10] sm:$0xff]  ;;  %v1199_v41 = vld [vmem:[%s2139_s27 + $0x8] sm:$0xff]  ;;  %s1135_s8 = sld [smem:[#allocation6 + %s1567_s7]] }
  0x72   : > { %v959_v21 = vld [vmem:[%s2149_s21] sm:$0xff]  ;;  %s1164_s9 = sld [smem:[#allocation5 + %s1163_s11]] }
  0x73   : > { %988 = vmatpush.msra.mxu2 %v969_v9  ;;  %1124 = vmatpush.msra.mxu0 %v1105_v19  ;;  %v1074_v22 = vld [vmem:[%s2150_s12] sm:$0x3f]  ;;  %v961_v23 = vsel %vm960_vm5, %v959_v21, 0.0  ;;  %v1269_v28 = vld [vmem:[%s2152_s4 + $0x38] sm:$0xff]  ;;  %v1268_v30 = vld [vmem:[%s2152_s4 + $0x30] sm:$0xff]  ;;  %s1180_s12 = sadd.s32 3, %s1567_s7 }
  0x74   : > { %1564 = vmatpush.msk.msrb.mxu3 %vm1079_vm6, %v1074_v22  ;;  %962 = vadd.xlane.f32.xlu0 %v961_v23  ;;  %v1656_v24 = vld [vmem:[%s2151_s14] ss:$0 sm:$0xff]  ;;  %v1267_v32 = vld [vmem:[%s2152_s4 + $0x28] sm:$0xff]  ;;  %v1265_v36 = vld [vmem:[%s2152_s4 + $0x18] sm:$0xff]  ;;  %s1134_s13 = sld [smem:[#allocation5 + %s1567_s7]] }
  0x75   : > { %989 = vmatpush.msra.mxu2 %v968_v10  ;;  %1125 = vmatpush.msra.mxu0 %v1104_v20  ;;  %v1202_v33 = vld [vmem:[%s2139_s27 + $0x20] sm:$0xff]  ;;  %v1264_v38 = vld [vmem:[%s2152_s4 + $0x10] sm:$0xff]  ;;  %v1263_v42 = vld [vmem:[%s2152_s4 + $0x8] sm:$0xff]  ;;  %s2038_s19 = sld [smem:[#allocation6 + %s1180_s12]] }
  0x76   : > { %v1266_v34 = vld [vmem:[%s2152_s4 + $0x20] sm:$0xff] }
  0x77   : > { %990 = vmatpush.msra.mxu2 %v967_v11  ;;  %v895_v39 = vld [vmem:[%s2153_s26] sm:$0x1]  ;;  %s1146_s26 = sadd.s32 1, %s1567_s7  ;;  %s1136_s21 = scvt.s32.f32 %s1135_s8 }
  0x78   : > { %v1198_v44 = vld [vmem:[%s2139_s27] sm:$0xff]  ;;  %s1148_s6 = sld [smem:[#allocation6 + %s1146_s26]] }
  0x79   : > { %991 = vmatpush.msra.mxu2 %v966_v12  ;;  %v1262_v45 = vld [vmem:[%s2152_s4] sm:$0xff]  ;;  %s1165_s4 = sld [smem:[#allocation6 + %s1163_s11]]  ;;  %v1139_v0 = vstv %s1136_s21  ;;  %s1167_s11 = scalar_lea.vmem [#allocation2], %s1164_s9 }
  0x7a   : > { %v1657_v48 = vld [vmem:[%s2154_s5] ss:$0 sm:$0xff]  ;;  %s1147_s5 = sld [smem:[#allocation5 + %s1146_s26]] }
  0x7b   : > { %992 = vmatpush.msra.mxu2 %v965_v13  ;;  %v1658_v53 = vld [vmem:[%s2155_s16] ss:$0 sm:$0xff]  ;;  %s1181_s16 = sld [smem:[#allocation5 + %s1180_s12]] }
  0x7c   : > { %1560 = vmatmul.msk.f32.vlgmr.msra.gmra.mxu2 %vm973_vm4, %v964_v14  ;;  %s1568_s29 = sadd.f32 -1.0, %s1136_s21  ;;  %s1784_s21 = smov 32  }
  0x7d   : > { %s2156_s8 = sld [smem:[#allocation26_spill]] }
  0x7e   : > { %s1149_s17 = scvt.s32.f32 %s1148_s6  ;;  %s1183_s6 = scvt.s32.f32 %s2038_s19  ;;  %v1142_v7 = vstv %s1568_s29 }
  0x7f   : > { %s1166_s14 = scvt.s32.f32 %s1165_s4  ;;  %s1137_s4 = scalar_lea.vmem [#allocation2], %s1134_s13 }
  0x80   : > { %s1569_s27 = sadd.f32 -1.0, %s1149_s17  ;;  %v1152_v63 = vstv %s1149_s17  ;;  %s1150_s7 = scalar_lea.vmem [#allocation2], %s1147_s5  ;;  %v1186_v13 = vstv %s1183_s6 }
  0x81   : > { %s1570_s25 = sadd.f32 -1.0, %s1166_s14  ;;  %v1169_v62 = vstv %s1166_s14  ;;  %s1184_s14 = scalar_lea.vmem [#allocation2], %s1181_s16 }
  0x82   : > { %v1155_v4 = vstv %s1569_s27  ;;  %s2157_s17 = sld [smem:[#allocation29_spill]]  ;;  %s1786_s13 = smov 48  }
  0x83   : > { %v1172_v2 = vstv %s1570_s25  ;;  %s1571_s9 = sadd.f32 -1.0, %s1183_s6  ;;  %s1785_s25 = smov 16   ;;  %v1213_v18 = vld [vmem:[%s2156_s8 + $0x38] sm:$0xff]  ;;  %v1212_v20 = vld [vmem:[%s2156_s8 + $0x30] sm:$0xff]  ;;  %v1211_v22 = vld [vmem:[%s2156_s8 + $0x28] sm:$0xff] }
  0x84   : > { %s2158_s29 = sld [smem:[#allocation31_spill]]  ;;  %s878_s16 = sand.u32 1, %s1743_s15  }
  0x85   : > { %v1189_v16 = vstv %s1571_s9  ;;  %s2159_s19 = sld [smem:[#allocation30_spill]] }
  0x86   : > { %s2160_s12 = sld [smem:[#allocation33_spill]] }
  0x87   : > { %s2161_s27 = sld [smem:[#allocation27_spill]] }
  0x88   : > { %v1277_v19 = vld [vmem:[%s2157_s17 + $0x38] sm:$0xff]  ;;  %v1275_v23 = vld [vmem:[%s2157_s17 + $0x28] sm:$0xff]  ;;  %s2162_s26 = sld [smem:[#allocation32_spill]] }
  0x89   : > { %1286 = vmatpush.msrb.mxu2 %v1277_v19  ;;  %s2163_s5 = sld [smem:[#allocation34_spill]] }
  0xe7   : > { %v963_v51 = vpop.xlane.xlu0 %962 }
  0xea   : > { %v956_v25 = vpop.f32.mrf.mxu1 }
  0xeb   : > { %v957_v26 = vadd.f32 %v1656_v24, %v956_v25  ;;  %v921_v40 = vpop.f32.mrf.mxu0  ;;  %v1210_v24 = vld [vmem:[%s2156_s8 + $0x20] sm:$0xff] }
  0xec   : > { %v922_v43 = vadd.f32 %v921_v40, %v895_v39  ;;  %v1274_v25 = vld [vmem:[%s2157_s17 + $0x20] sm:$0xff] }
  0xed   : > { %1561 = vmatmul.msk.f32.vlgmr.msra.gmra.mxu3 %vm1003_vm7, %v957_v26  ;;  %1562 = vmatmul.msk.f32.vlgmr.msrb.gmra.mxu0 %vm1003_vm7, %v957_v26  ;;  %v1340_v39 = vld [vmem:[%s2158_s29] sm:$0xff] }
  0xee   : > { %1248 = vmatpush.msra.mxu3 %v1205_v27  ;;  %1306 = vmatpush.msrb.mxu0 %v1269_v28  ;;  %v1273_v27 = vld [vmem:[%s2157_s17 + $0x18] sm:$0xff]  ;;  %v1208_v28 = vld [vmem:[%s2156_s8 + $0x10] sm:$0xff] }
  0xf0   : > { %1249 = vmatpush.msra.mxu3 %v1204_v29  ;;  %1307 = vmatpush.msrb.mxu0 %v1268_v30  ;;  %v1272_v29 = vld [vmem:[%s2157_s17 + $0x10] sm:$0xff]  ;;  %v1207_v30 = vld [vmem:[%s2156_s8 + $0x8] sm:$0xff] }
  0xf2   : > { %1250 = vmatpush.msra.mxu3 %v1203_v31  ;;  %1308 = vmatpush.msrb.mxu0 %v1267_v32  ;;  %v1271_v31 = vld [vmem:[%s2157_s17 + $0x8] sm:$0xff]  ;;  %v1206_v32 = vld [vmem:[%s2156_s8] sm:$0xff] }
  0xf4   : > { %1251 = vmatpush.msra.mxu3 %v1202_v33  ;;  %1309 = vmatpush.msrb.mxu0 %v1266_v34  ;;  %v1270_v33 = vld [vmem:[%s2157_s17] sm:$0xff] }
  0xf5   : > { %1566 = vmatmul.msk.f32.vlgmr.msra.gmra.mxu0 %vm1003_vm7, %v957_v26  ;;  %v1209_v26 = vld [vmem:[%s2156_s8 + $0x18] sm:$0xff] }
  0xf6   : > { %1252 = vmatpush.msra.mxu3 %v1201_v35  ;;  %1310 = vmatpush.msrb.mxu0 %v1265_v36 }
  0xf8   : > { %1253 = vmatpush.msra.mxu3 %v1200_v37  ;;  %1311 = vmatpush.msrb.mxu0 %v1264_v38  ;;  %v1341_v38 = vld [vmem:[%s2158_s29 + $0x8] sm:$0xff] }
  0xfa   : > { %1254 = vmatpush.msra.mxu3 %v1199_v41  ;;  %1312 = vmatpush.msrb.mxu0 %v1263_v42  ;;  %v1318_v42 = vld [vmem:[%s2159_s19] sm:$0x1] }
  0xfc   : > { %1255 = vmatpush.msra.mxu3 %v1198_v44  ;;  %1313 = vmatpush.msrb.mxu0 %v1262_v45  ;;  %v1370_v45 = vld [vmem:[%s2160_s12 + $0x18] sm:$0xff] }
  0xfd   : > { %1575 = vmatmul.msk.f32.vlgmr.msrb.gmra.mxu0 %vm973_vm4, %v922_v43 }
  0xff   : > { %v994_v46 = vpop.f32.mrf.mxu2 }
 0x100   : > { %1565 = vmatmul.msk.f32.vlgmr.msrb.gmra.mxu3 %vm1075_vm8, %v994_v46 }
 0x101   : > { %1388 = vmatpush.msrb.mxu3 %v1370_v45 }
 0x108   : > { %1573 = vmatmul.msk.f32.vlgmr.msra.gmra.mxu3 %vm973_vm4, %v922_v43 }
 0x16a   : > { %v1047_v47 = vpop.f32.mrf.mxu0 }
 0x16b   : > { %1068 = vmatpush.msrb.mxu1 %v1047_v47 }
 0x16c   : > { %1563 = vmatmul.msk.f32.vlgmr.msrb.gmra.mxu1 %vm960_vm5, %v959_v21  ;;  %v1276_v21 = vld [vmem:[%s2157_s17 + $0x30] sm:$0xff] }
 0x16d   : > { %1225 = vmatpush.msra.mxu1 %v1213_v18  ;;  %1287 = vmatpush.msrb.mxu2 %v1276_v21 }
 0x16f   : > { %1226 = vmatpush.msra.mxu1 %v1212_v20  ;;  %1288 = vmatpush.msrb.mxu2 %v1275_v23 }
 0x170   : > { %v1024_v49 = vpop.f32.mrf.mxu3 }
 0x171   : > { %v1025_v50 = vadd.f32 %v1657_v48, %v1024_v49  ;;  %1227 = vmatpush.msra.mxu1 %v1211_v22  ;;  %1289 = vmatpush.msrb.mxu2 %v1274_v25 }
 0x172   : > { %v1127_v54 = vpop.f32.mrf.mxu0 }
 0x173   : > { %v1027_v52 = vmul.f32 %v1025_v50, %v963_v51  ;;  %v1128_v58 = vadd.f32 %v1658_v53, %v1127_v54  ;;  %1228 = vmatpush.msra.mxu1 %v1210_v24  ;;  %1290 = vmatpush.msrb.mxu2 %v1273_v27 }
 0x175   : > { %1229 = vmatpush.msra.mxu1 %v1209_v26  ;;  %1291 = vmatpush.msrb.mxu2 %v1272_v29 }
 0x177   : > { %1230 = vmatpush.msra.mxu1 %v1208_v28  ;;  %1292 = vmatpush.msrb.mxu2 %v1271_v31 }
 0x179   : > { %1231 = vmatpush.msra.mxu1 %v1207_v30  ;;  %1293 = vmatpush.msrb.mxu2 %v1270_v33 }
 0x17a   : > { %v1315_v40 = vpop.f32.mrf.mxu0 }
 0x17b   : > { %1232 = vmatpush.msra.mxu1 %v1206_v32 }
 0x17d   : > { %1360 = vmatpush.msrb.mxu1 %v1341_v38 }
 0x17f   : > { %1361 = vmatpush.msrb.mxu1 %v1340_v39 }
 0x183   : > { %v1100_v57 = vpop.f32.mrf.mxu3 }
 0x18b   : > { %v1257_v53 = vpop.f32.mrf.mxu3 }
 0x1e9   : > { %v1070_v55 = vpop.f32.mrf.mxu1 }
 0x1ea   : > { %v1073_v56 = vadd.f32 %v1070_v55, %v1027_v52 }
 0x1ec   : > { %v1103_v59 = vadd.f32 %v1100_v57, %v1073_v56 }
 0x1ee   : > { %v1130_v60 = vadd.f32 %v1128_v58, %v1103_v59  ;;  %v1260_v58 = vld [vmem:[%s2161_s27] sm:$0x1] }
 0x1f0   : > { %v1131_v61 = vmax.f32 %v1130_v60, 0.0 }
 0x1f2   : > { %1132 = vst.msk [vmem:[#allocation2] sm:$0xff] %vm1003_vm7, %v1131_v61 }
 0x1f9   : > { %v1168_v1 = vld [vmem:[%s1167_s11] sm:$0x1]  ;;  %s1436_s11 = scalar_lea.hbm %s1936_s10, %s1964_s20  ;;  %s1707_s20 = scalar_lea.hbm %s1936_s10, 2 }
 0x1fa   : > { %v1151_v3 = vld [vmem:[%s1150_s7] sm:$0x1]  ;;  %v1170_v5 = vmul.f32 %v1169_v62, %v1168_v1  ;;  %v1369_v1 = vld [vmem:[%s2160_s12 + $0x10] sm:$0xff]  ;;  %s879_s7 = scalar_lea.vmem [#allocation7], %s878_s16 }
 0x1fb   : > { %v1153_v6 = vmul.f32 %v1152_v63, %v1151_v3  ;;  %v1138_v8 = vld [vmem:[%s1137_s4] sm:$0x1]  ;;  %1389 = vmatpush.msrb.mxu3 %v1369_v1  ;;  %s1438_s6 = sshll.u32 %s879_s7, 4  ;;  %s1440_s4 = sshll.u32 %s1436_s11, 4  ;;  %s1439_s6 = int_to_ptr.vmem [resolvable:$true] %s1438_s6  ;;  %s1441_s4 = int_to_ptr.hbm [resolvable:$true] %s1440_s4 }
 0x1fc   : > { %v1140_v9 = vmul.f32 %v1139_v0, %v1138_v8  ;;  %v1173_v10 = vadd.f32 %v1172_v2, %v1170_v5  ;;  %v1185_v12 = vld [vmem:[%s1184_s14] sm:$0x1]  ;;  %v1368_v2 = vld [vmem:[%s2160_s12 + $0x8] sm:$0xff]  ;;  %s1428_s14 = scalar_lea.sflag [#allocation8], %s878_s16  ;;  %s1701_s9 = sshra.s32 %s1441_s4, 4  ;;  %s1702_s9 = int_to_ptr.hbm [resolvable:$true] %s1701_s9 }
 0x1fd   : > { %v1156_v11 = vadd.f32 %v1155_v4, %v1153_v6  ;;  %v1187_v15 = vmul.f32 %v1186_v13, %v1185_v12  ;;  %1390 = vmatpush.msrb.mxu3 %v1368_v2  ;;  %v1367_v3 = vld [vmem:[%s2160_s12] sm:$0xff]  ;;  %v1400_v4 = vld [vmem:[%s1925_s3 + $0x18] sm:$0xff]  ;;  %p1708_p10 = scmp.lt.s32.totalorder %s1702_s9, %s1936_s10 }
 0x1fe   : > { %v1143_v14 = vadd.f32 %v1142_v7, %v1140_v9  ;;  %1175 = vrot.lane.b32.xlu1 %v1173_v10, %s1784_s21  ;;  %1417 = vmatpush.msra.mxu2 %v1400_v4  ;;  %v1342_v5 = vld [vmem:[%s2162_s26] sm:$0x1]  ;;  %v1399_v9 = vld [vmem:[%s1925_s3 + $0x10] sm:$0xff]  ;;  %v1398_v10 = vld [vmem:[%s1925_s3 + $0x8] sm:$0xff]  ;;  %s1703_s21 = scalar_lea.hbm %s1702_s9, 1 }
 0x1ff   : > { %1158 = vrot.lane.b32.xlu0 %v1156_v11, %s1785_s25  ;;  %v1190_v17 = vadd.f32 %v1189_v16, %v1187_v15  ;;  %1391 = vmatpush.msrb.mxu3 %v1367_v3  ;;  %v1397_v11 = vld [vmem:[%s1925_s3] sm:$0xff]  ;;  %p1704_p7 = scmp.ne.s32.totalorder %s1702_s9, %s1703_s21  ;;  %p1709_p11 = scmp.lt.s32.totalorder %s1707_s20, %s1703_s21 }
 0x200   : > { %1145 = vst.msk [vmem:[#allocation3] sm:$0x1] %vm1144_vm9, %v1143_v14  ;;  %1418 = vmatpush.msra.mxu2 %v1399_v9  ;;  %v1371_v12 = vld [vmem:[%s1920_s24] sm:$0x1] }
 0x201   : > { %v1401_v16 = vld [vmem:[%s2163_s5] sm:$0x1]  ;;  %p1705_p8 = pnand %p1704_p7, %p1981_p1  ;;  %p1710_p12 = por %p1709_p11, %p1708_p10 }
 0x202   : > { %1419 = vmatpush.msra.mxu2 %v1398_v10 }
 0x203   : > { %p1706_p9 = pneg %p1705_p8 }
 0x204   : > { %1420 = vmatpush.msra.mxu2 %v1397_v11 }
 0x205   : > { %p1711_p13 = pnand %p1710_p12, %p1706_p9 }
 0x206   : > { %1192 = vrot.lane.b32.xlu1 %v1190_v17, %s1786_s13 }
 0x270   : > { %v1176_v34 = vpop.permute.xlu1 %1175 }
 0x271   : > { %v1159_v35 = vpop.permute.xlu0 %1158 }
 0x272   : > { %1162 = vst.msk [vmem:[#allocation3] sm:$0x1] %vm1161_vm10, %v1159_v35 }
 0x273   : > { %1179 = vst.msk [vmem:[#allocation3] sm:$0x1] %vm1178_vm11, %v1176_v34 }
 0x278   : > { %v1193_v36 = vpop.permute.xlu1 %1192 }
 0x279   : > { %1196 = vst.msk [vmem:[#allocation3] sm:$0x1] %vm1195_vm12, %v1193_v36 }
 0x280   : > { %v1197_v37 = vld [vmem:[#allocation3] sm:$0x1] }
 0x281   : > { %1572 = vmatmul.msk.f32.vlgmr.msra.gmra.mxu1 %vm973_vm4, %v1197_v37  ;;  %1574 = vmatmul.msk.f32.vlgmr.msrb.gmra.mxu2 %vm973_vm4, %v1197_v37 }
 0x2fe   : > { %v1234_v51 = vpop.f32.mrf.mxu1 }
 0x2ff   : > { %v1258_v55 = vadd.f32 %v1257_v53, %v1234_v51 }
 0x301   : > { %v1261_v61 = vadd.f32 %v1260_v58, %v1258_v55 }
 0x304   : > { %v1295_v41 = vpop.f32.mrf.mxu2 }
 0x305   : > { %v1316_v43 = vadd.f32 %v1315_v40, %v1295_v41 }
 0x307   : > { %v1319_v44 = vadd.f32 %v1318_v42, %v1316_v43 }
 0x309   : > { %v1576_v46 = vmul.f32 -1.442695, %v1319_v44 }
 0x30b   : > { %1659 = vpow2.f32 %v1576_v46 }
 0x311   : > { %v1660_v47 = vpop.eup %1659 }
 0x312   : > { %v1323_v48 = vadd.f32 1.0, %v1660_v47 }
 0x314   : > { %1661 = vrcp.f32 %v1323_v48  ;;  %v1335_v54 = vand.u32 2147483648, %v1323_v48  ;;  %v1333_v57 = vand.u32 2147483647, %v1323_v48  ;;  %vm1329_vm14 = vweird.f32 %v1323_v48 }
 0x316   : > { %v1336_v60 = vor.u32 1.1754944e-38, %v1335_v54  ;;  %vm1334_vm0 = vcmp.eq.f32.partialorder %v1333_v57, 8.507059e+37 }
 0x31a   : > { %v1662_v49 = vpop.eup %1661 }
 0x31b   : > { %v1325_v50 = vmul.f32 %v1662_v49, %v1323_v48  ;;  %vm1330_vm13 = vweird.f32 %v1662_v49 }
 0x31c   : > { %vm1331_vm15 = vmor %vm1329_vm14, %vm1330_vm13 }
 0x31d   : > { %v1326_v52 = vsub.f32 1.0, %v1325_v50 }
 0x31f   : > { %v1327_v56 = vmul.f32 %v1662_v49, %v1326_v52 }
 0x321   : > { %v1328_v59 = vadd.f32 %v1662_v49, %v1327_v56 }
 0x323   : > { %v1332_v62 = vsel %vm1331_vm15, %v1662_v49, %v1328_v59 }
 0x324   : > { %v1337_v63 = vsel %vm1334_vm0, %v1336_v60, %v1332_v62 }
 0x325   : > { %v1339_v0 = vmul.f32 %v1337_v63, %v1261_v61 }
 0x327   : > { %1577 = vmatmul.msk.f32.vlgmr.msrb.gmra.mxu1 %vm1003_vm7, %v1339_v0 }
 0x3a4   : > { %v1363_v6 = vpop.f32.mrf.mxu1 }
 0x3a5   : > { %v1364_v7 = vadd.f32 %v1363_v6, %v1342_v5 }
 0x3a7   : > { %v1366_v8 = vmax.f32 %v1364_v7, 0.0 }
 0x3a9   : > { %1578 = vmatmul.msk.f32.vlgmr.msrb.gmra.mxu3 %vm1372_vm1, %v1366_v8 }
 0x42c   : > { %v1393_v13 = vpop.f32.mrf.mxu3 }
 0x42d   : > { %v1394_v14 = vadd.f32 %v1393_v13, %v1371_v12 }
 0x42f   : > { %v1396_v15 = vmax.f32 %v1394_v14, 0.0 }
 0x431   : > { %1579 = vmatmul.msk.f32.vlgmr.msra.gmra.mxu2 %vm1372_vm1, %v1396_v15 }
 0x4b4   : > { %v1422_v17 = vpop.f32.mrf.mxu2 }
 0x4b5   : > { %v1423_v18 = vadd.f32 %v1422_v17, %v1401_v16 }
 0x4b7   : > { %1426 = vst.msk [vmem:[%s879_s7] sm:$0x1] %vm1425_vm2, %v1423_v18 }
 0x4b8   : > { %1714 = shalt.err (!%p1711_p13)
}
 0x4b9   : > { %1583 = dma.vmem_to_hbm [thread:$0]  (%p1981_p1), %s1439_s6, 16, %s1441_s4, %s1428_s14  }
 0x4ba PF: > { %p1589_p0 = scmp.ge.s32.totalorder %s1751_s2, 2  ;;  %s1452_s25 = sand.u32 1, %s1739_s0  }
 0x4bb   : > { %s1453_s13 = scalar_lea.sflag [#allocation8], %s1452_s25 }
 0x4bc   : > { %p1586_p3 = pnand %p1589_p0, %p1985_p2 }
 0x4be   : > { %p1587_p4 = pneg %p1586_p3 }
 0x4c0   : > { %1734 = dma.done.wait (%p1587_p4), %s1453_s13, 16  }
 0x4c1   : > { %1736 = vsyncadd (%p1587_p4), %s1453_s13, 4294967280  ;;  %p82_p5 = scmp.ge.s32.totalorder %s1968_s23, 4   ;;  %s2164_s0 = smov %s1743_s15 }
 0x4c2   : > { %s2165_s15 = smov %s1747_s28  ;;  %s2166_s28 = smov %s1979_s18 }
 0x4c3   : > { %s2167_s2 = smov %s1968_s23  ;;  %84 = sbr.rel (!%p82_p5) target bundleno = 85 (0x55), region = 202 }
 0x4c8   :  { %1458 = vsyncpa [#allocation8], 1 }
 0x4c9   :  { %1460 = vsyncpa [#allocation8 + $0x1], 1 }

</bundles_post_ra>
